<compile_context>
chip_gen: v7x
topology: tpu7x:2x2x1
jax: 0.10.0
libtpu: 0.0.40
codegen_flags: <defaults>
</compile_context>

<pallas_src>
import jax
import jax.numpy as jnp
from jax import lax
from jax.experimental import pallas as pl
from jax.experimental.pallas import tpu as pltpu


def _recurrent_readout_kernel(x_ref, w_ref, alpha_ref, bias_ref, r0_ref,
                              r_seq_ref, wx_sc, r_sc):
    # x_ref:     (TT, C, HW)  TT time steps of one batch row (batch dim squeezed)
    # w_ref:     (C, O)       W_out pre-transposed in the wrapper
    # alpha_ref: (1, O)
    # bias_ref:  (1, O)
    # r0_ref:    (B, O)       full initial-state array (row selected in-kernel)
    # r_seq_ref: (TT, O)      output rows for this (b, t) block
    # wx_sc:     (TT, O) f32  staging: W x_t + b, overwritten in place with r_t
    # r_sc:      (1, O)  f32  recurrent state carried across the sequential axis
    b = pl.program_id(0)
    t = pl.program_id(1)

    @pl.when(t == 0)
    def _():
        r_sc[...] = r0_ref[pl.ds(b, 1), :].astype(jnp.float32)

    # Spatial mean over H*W for all TT steps at once (XLU lane reduce).
    x_mean = jnp.mean(x_ref[...].astype(jnp.float32), axis=-1)          # (TT, C)

    # One batched MXU matmul for the whole time block; bias folded in once
    # per block (not per time step).
    wx_sc[...] = jnp.dot(x_mean, w_ref[...],
                         preferred_element_type=jnp.float32,
                         precision=lax.Precision.HIGHEST) + bias_ref[...]

    alpha = alpha_ref[...]                                               # (1, O)
    tt = x_ref.shape[0]

    def step(i, r):
        r = alpha * r + wx_sc[pl.ds(i, 1), :]
        wx_sc[pl.ds(i, 1), :] = r          # wx_sc row i now holds r at step i
        return r

    r = lax.fori_loop(0, tt, step, r_sc[...],
                      unroll=True if tt <= 16 else 8)
    r_sc[...] = r
    r_seq_ref[...] = wx_sc[...].astype(r_seq_ref.dtype)   # single bulk store


def _choose_block_t(T, C, HW, itemsize):
    # Double-buffered x block is 2 * TT * C * HW * itemsize bytes.  Keep one
    # buffer <= ~4 MiB so the pair fits comfortably in the default scoped VMEM
    # on v5e (16 MiB) as well as v6e/v7x (32 MiB scoped / 64 MiB physical),
    # with headroom for the other (tiny) operands.
    budget = 4 * 1024 * 1024
    cap = max(1, budget // (C * HW * itemsize))
    cap = min(cap, 256)                      # bound the in-kernel loop length
    best = 1
    for d in range(1, T + 1):
        if T % d == 0 and d <= cap:
            best = d
    return best


def recurrent_readout(x, W_out, b_out, alpha, r0=None, block_t=None):
    """x: (B, T, C, H, W). Returns (r_seq (B, T, O), r_final (B, O))."""
    B, T, C, H, Wd = x.shape
    O = W_out.shape[0]
    HW = H * Wd

    if r0 is None:
        r0 = jnp.zeros((B, O), jnp.float32)
    r0 = r0.astype(jnp.float32)

    if T == 0:                               # empty sequence: match reference
        return jnp.zeros((B, 0, O), x.dtype), r0.astype(x.dtype)

    if block_t is None:
        block_t = _choose_block_t(T, C, HW, x.dtype.itemsize)
    if T % block_t != 0:
        raise ValueError(f"block_t={block_t} must divide T={T}")
    nt = T // block_t

    x4 = x.reshape(B, T, C, HW)              # contiguous reshape: free, no copy
    w_t = W_out.T.astype(jnp.float32)        # (C, O), hoisted out of the kernel
    a2 = alpha.reshape(1, O).astype(jnp.float32)
    b2 = b_out.reshape(1, O).astype(jnp.float32)

    grid_spec = pltpu.PrefetchScalarGridSpec(
        num_scalar_prefetch=0,
        grid=(B, nt),                        # (parallel batch, sequential time)
        in_specs=[
            # x: index T directly; last-two block dims (C, HW) are full dims.
            pl.BlockSpec((None, block_t, C, HW), lambda b, t: (b, t, 0, 0)),
            pl.BlockSpec((C, O), lambda b, t: (0, 0)),     # W^T (grid-invariant)
            pl.BlockSpec((1, O), lambda b, t: (0, 0)),     # alpha
            pl.BlockSpec((1, O), lambda b, t: (0, 0)),     # bias
            pl.BlockSpec((B, O), lambda b, t: (0, 0)),     # r0 (row picked in-kernel)
        ],
        out_specs=pl.BlockSpec((None, None, block_t, O),
                               lambda b, t: (b, t, 0, 0)),
        scratch_shapes=[pltpu.VMEM((block_t, O), jnp.float32),  # wx / r_seq stage
                        pltpu.VMEM((1, O), jnp.float32)],       # recurrent state
    )

    r_seq_blk = pl.pallas_call(
        _recurrent_readout_kernel,
        out_shape=jax.ShapeDtypeStruct((B, nt, block_t, O), x.dtype),
        grid_spec=grid_spec,
        compiler_params=pltpu.CompilerParams(
            dimension_semantics=("parallel", "arbitrary")),
    )(x4, w_t, a2, b2, r0)

    r_seq = r_seq_blk.reshape(B, T, O)       # contiguous reshape: free
    return r_seq, r_seq[:, -1, :]            # r_final = last step (no extra output)


def _reference(x, W_out, b_out, alpha, r0=None):
    B, T, C, H, Wd = x.shape
    O = W_out.shape[0]
    r = jnp.zeros((B, O), jnp.float32) if r0 is None else r0.astype(jnp.float32)
    w_t = W_out.T.astype(jnp.float32)
    outs = []
    for t in range(T):
        x_t = jnp.mean(x[:, t].astype(jnp.float32), axis=(2, 3))
        r = (alpha[None, :] * r
             + jnp.matmul(x_t, w_t, precision=lax.Precision.HIGHEST)
             + b_out[None, :])
        outs.append(r[:, None, :])
    return jnp.concatenate(outs, axis=1).astype(x.dtype), r.astype(x.dtype)


if __name__ == "__main__":
    key = jax.random.PRNGKey(0)
    k1, k2, k3, k4, k5, k6 = jax.random.split(key, 6)

    # Config 1: mirrors RecurrentReadout.reset_parameters()
    # (W_out = 0.5 * eye, bias = 0, alpha = 0.9); B=2, T=8, C=4, H=W=16, O=4.
    B, T, C, H, W = 2, 8, 4, 16, 16
    input_size, output_size = C, 4
    x = jax.random.normal(k1, (B, T, C, H, W), dtype=jnp.float32)
    W_out = 0.5 * jnp.eye(output_size, input_size, dtype=jnp.float32)
    b_out = jnp.zeros((output_size,), dtype=jnp.float32)
    alpha = jnp.full((output_size,), 0.9, dtype=jnp.float32)

    r_seq, r_fin = recurrent_readout(x, W_out, b_out, alpha)
    jax.block_until_ready((r_seq, r_fin))
    r_seq_ref, r_fin_ref = _reference(x, W_out, b_out, alpha)
    assert r_seq.shape == (B, T, output_size)
    assert r_fin.shape == (B, output_size)
    assert jnp.allclose(r_seq, r_seq_ref, atol=2e-5, rtol=2e-5)
    assert jnp.allclose(r_fin, r_fin_ref, atol=2e-5, rtol=2e-5)

    # Config 2: random params + explicit r0, T=16 with block_t=4 so the state
    # carry crosses sequential grid steps and the parallel batch axis is used.
    T2, O2 = 16, 4
    x2 = jax.random.normal(k2, (B, T2, C, H, W), dtype=jnp.float32)
    W2 = 0.3 * jax.random.normal(k3, (O2, C), dtype=jnp.float32)
    b2 = 0.1 * jax.random.normal(k4, (O2,), dtype=jnp.float32)
    a2 = jax.random.uniform(k5, (O2,), minval=0.5, maxval=0.99, dtype=jnp.float32)
    r0 = jax.random.normal(k6, (B, O2), dtype=jnp.float32)

    r_seq2, r_fin2 = recurrent_readout(x2, W2, b2, a2, r0=r0, block_t=4)
    jax.block_until_ready((r_seq2, r_fin2))
    r_seq2_ref, r_fin2_ref = _reference(x2, W2, b2, a2, r0=r0)
    assert jnp.allclose(r_seq2, r_seq2_ref, atol=2e-5, rtol=2e-5)
    assert jnp.allclose(r_fin2, r_fin2_ref, atol=2e-5, rtol=2e-5)

    print("KERNEL_OK")
</pallas_src>

<mosaic_0001>
module attributes {stable_mosaic.version = 11 : i64} {
  func.func @_recurrent_readout_kernel(%arg0: i32, %arg1: i32, %arg2: memref<1x8x4x256xf32, #tpu.memory_space<vmem>>, %arg3: memref<4x4xf32, #tpu.memory_space<vmem>>, %arg4: memref<1x4xf32, #tpu.memory_space<vmem>>, %arg5: memref<1x4xf32, #tpu.memory_space<vmem>>, %arg6: memref<2x4xf32, #tpu.memory_space<vmem>>, %arg7: memref<1x1x8x4xf32, #tpu.memory_space<vmem>>, %arg8: memref<8x4xf32, #tpu.memory_space<vmem>>, %arg9: memref<1x4xf32, #tpu.memory_space<vmem>>) attributes {dimension_semantics = [#tpu.dimension_semantics<parallel>, #tpu.dimension_semantics<arbitrary>], iteration_bounds = array<i64: 2, 1>, scalar_prefetch = 0 : i64, scratch_operands = 2 : i64, tpu.core_type = #tpu.core_type<tc>, window_params = [{transform_indices = @transform_0, window_bounds = array<i64: 1, 8, 4, 256>}, {pipeline_mode = #tpu.pipeline_mode<synchronous>, transform_indices = @transform_1, window_bounds = array<i64: 4, 4>}, {pipeline_mode = #tpu.pipeline_mode<synchronous>, transform_indices = @transform_2, window_bounds = array<i64: 1, 4>}, {pipeline_mode = #tpu.pipeline_mode<synchronous>, transform_indices = @transform_3, window_bounds = array<i64: 1, 4>}, {pipeline_mode = #tpu.pipeline_mode<synchronous>, transform_indices = @transform_4, window_bounds = array<i64: 2, 4>}, {transform_indices = @transform_5, window_bounds = array<i64: 1, 1, 8, 4>}]} {
    %c0_i32 = arith.constant 0 : i32
    %0 = arith.cmpi eq, %arg1, %c0_i32 : i32
    %1 = arith.extui %0 : i1 to i32
    %c0_i32_0 = arith.constant 0 : i32
    %2 = arith.cmpi ne, %1, %c0_i32_0 : i32
    scf.if %2 {
      %69 = arith.index_cast %arg0 : i32 to index
      %c0_41 = arith.constant 0 : index
      %70 = vector.load %arg6[%69, %c0_41] : memref<2x4xf32, #tpu.memory_space<vmem>>, vector<1x4xf32>
      %c0_42 = arith.constant 0 : index
      %c0_43 = arith.constant 0 : index
      %71 = vector.load %arg9[%c0_42, %c0_43] : memref<1x4xf32, #tpu.memory_space<vmem>>, vector<1x4xf32>
      tpu.vector_store %arg9[%c0_42, %c0_43], %70 {strides = array<i32>} : memref<1x4xf32, #tpu.memory_space<vmem>>, vector<1x4xf32>,
    } else {
    }
    %c0 = arith.constant 0 : index
    %c0_1 = arith.constant 0 : index
    %c0_2 = arith.constant 0 : index
    %c0_3 = arith.constant 0 : index
    %3 = vector.load %arg2[%c0, %c0_1, %c0_2, %c0_3] : memref<1x8x4x256xf32, #tpu.memory_space<vmem>>, vector<1x8x4x256xf32>
    %4 = vector.shape_cast %3 : vector<1x8x4x256xf32> to vector<8x4x256xf32>
    %cst = arith.constant dense<0.000000e+00> : vector<8x4xf32>
    %5 = vector.multi_reduction <add>, %4, %cst [2] : vector<8x4x256xf32> to vector<8x4xf32>
    %cst_4 = arith.constant 2.560000e+02 : f32
    %6 = vector.broadcast %cst_4 : f32 to vector<8x4xf32>
    %7 = arith.divf %5, %6 : vector<8x4xf32>
    %c0_5 = arith.constant 0 : index
    %c0_6 = arith.constant 0 : index
    %8 = vector.load %arg3[%c0_5, %c0_6] : memref<4x4xf32, #tpu.memory_space<vmem>>, vector<4x4xf32>
    %cst_7 = arith.constant dense<0.000000e+00> : vector<8x4xf32>
    %9 = tpu.matmul %7, %8, %cst_7 {dimension_numbers = #tpu.dot_dimension_numbers<[1], [0], [0], [1], [0, 0, 1, 1], [], []>, precision = #tpu.contract_precision<fp32>} : vector<8x4xf32>, vector<4x4xf32>, vector<8x4xf32> -> vector<8x4xf32>
    %c0_8 = arith.constant 0 : index
    %c0_9 = arith.constant 0 : index
    %10 = vector.load %arg5[%c0_8, %c0_9] : memref<1x4xf32, #tpu.memory_space<vmem>>, vector<1x4xf32>
    %11 = vector.broadcast %10 : vector<1x4xf32> to vector<8x4xf32>
    %12 = arith.addf %9, %11 : vector<8x4xf32>
    %c0_10 = arith.constant 0 : index
    %c0_11 = arith.constant 0 : index
    %13 = vector.load %arg8[%c0_10, %c0_11] : memref<8x4xf32, #tpu.memory_space<vmem>>, vector<8x4xf32>
    tpu.vector_store %arg8[%c0_10, %c0_11], %12 {strides = array<i32>} : memref<8x4xf32, #tpu.memory_space<vmem>>, vector<8x4xf32>,
    %c0_12 = arith.constant 0 : index
    %c0_13 = arith.constant 0 : index
    %14 = vector.load %arg4[%c0_12, %c0_13] : memref<1x4xf32, #tpu.memory_space<vmem>>, vector<1x4xf32>
    %c0_14 = arith.constant 0 : index
    %c0_15 = arith.constant 0 : index
    %15 = vector.load %arg9[%c0_14, %c0_15] : memref<1x4xf32, #tpu.memory_space<vmem>>, vector<1x4xf32>
    %c0_i32_16 = arith.constant 0 : i32
    %16 = arith.mulf %14, %15 : vector<1x4xf32>
    %17 = arith.index_cast %c0_i32_16 : i32 to index
    %c0_17 = arith.constant 0 : index
    %18 = vector.load %arg8[%17, %c0_17] : memref<8x4xf32, #tpu.memory_space<vmem>>, vector<1x4xf32>
    %19 = arith.addf %16, %18 : vector<1x4xf32>
    %20 = arith.index_cast %c0_i32_16 : i32 to index
    %c0_18 = arith.constant 0 : index
    %21 = vector.load %arg8[%20, %c0_18] : memref<8x4xf32, #tpu.memory_space<vmem>>, vector<1x4xf32>
    tpu.vector_store %arg8[%20, %c0_18], %19 {strides = array<i32>} : memref<8x4xf32, #tpu.memory_space<vmem>>, vector<1x4xf32>,
    %c1_i32 = arith.constant 1 : i32
    %22 = arith.mulf %14, %19 : vector<1x4xf32>
    %23 = arith.index_cast %c1_i32 : i32 to index
    %c0_19 = arith.constant 0 : index
    %24 = vector.load %arg8[%23, %c0_19] : memref<8x4xf32, #tpu.memory_space<vmem>>, vector<1x4xf32>
    %25 = arith.addf %22, %24 : vector<1x4xf32>
    %26 = arith.index_cast %c1_i32 : i32 to index
    %c0_20 = arith.constant 0 : index
    %27 = vector.load %arg8[%26, %c0_20] : memref<8x4xf32, #tpu.memory_space<vmem>>, vector<1x4xf32>
    tpu.vector_store %arg8[%26, %c0_20], %25 {strides = array<i32>} : memref<8x4xf32, #tpu.memory_space<vmem>>, vector<1x4xf32>,
    %c2_i32 = arith.constant 2 : i32
    %28 = arith.mulf %14, %25 : vector<1x4xf32>
    %29 = arith.index_cast %c2_i32 : i32 to index
    %c0_21 = arith.constant 0 : index
    %30 = vector.load %arg8[%29, %c0_21] : memref<8x4xf32, #tpu.memory_space<vmem>>, vector<1x4xf32>
    %31 = arith.addf %28, %30 : vector<1x4xf32>
    %32 = arith.index_cast %c2_i32 : i32 to index
    %c0_22 = arith.constant 0 : index
    %33 = vector.load %arg8[%32, %c0_22] : memref<8x4xf32, #tpu.memory_space<vmem>>, vector<1x4xf32>
    tpu.vector_store %arg8[%32, %c0_22], %31 {strides = array<i32>} : memref<8x4xf32, #tpu.memory_space<vmem>>, vector<1x4xf32>,
    %c3_i32 = arith.constant 3 : i32
    %34 = arith.mulf %14, %31 : vector<1x4xf32>
    %35 = arith.index_cast %c3_i32 : i32 to index
    %c0_23 = arith.constant 0 : index
    %36 = vector.load %arg8[%35, %c0_23] : memref<8x4xf32, #tpu.memory_space<vmem>>, vector<1x4xf32>
    %37 = arith.addf %34, %36 : vector<1x4xf32>
    %38 = arith.index_cast %c3_i32 : i32 to index
    %c0_24 = arith.constant 0 : index
    %39 = vector.load %arg8[%38, %c0_24] : memref<8x4xf32, #tpu.memory_space<vmem>>, vector<1x4xf32>
    tpu.vector_store %arg8[%38, %c0_24], %37 {strides = array<i32>} : memref<8x4xf32, #tpu.memory_space<vmem>>, vector<1x4xf32>,
    %c4_i32 = arith.constant 4 : i32
    %40 = arith.mulf %14, %37 : vector<1x4xf32>
    %41 = arith.index_cast %c4_i32 : i32 to index
    %c0_25 = arith.constant 0 : index
    %42 = vector.load %arg8[%41, %c0_25] : memref<8x4xf32, #tpu.memory_space<vmem>>, vector<1x4xf32>
    %43 = arith.addf %40, %42 : vector<1x4xf32>
    %44 = arith.index_cast %c4_i32 : i32 to index
    %c0_26 = arith.constant 0 : index
    %45 = vector.load %arg8[%44, %c0_26] : memref<8x4xf32, #tpu.memory_space<vmem>>, vector<1x4xf32>
    tpu.vector_store %arg8[%44, %c0_26], %43 {strides = array<i32>} : memref<8x4xf32, #tpu.memory_space<vmem>>, vector<1x4xf32>,
    %c5_i32 = arith.constant 5 : i32
    %46 = arith.mulf %14, %43 : vector<1x4xf32>
    %47 = arith.index_cast %c5_i32 : i32 to index
    %c0_27 = arith.constant 0 : index
    %48 = vector.load %arg8[%47, %c0_27] : memref<8x4xf32, #tpu.memory_space<vmem>>, vector<1x4xf32>
    %49 = arith.addf %46, %48 : vector<1x4xf32>
    %50 = arith.index_cast %c5_i32 : i32 to index
    %c0_28 = arith.constant 0 : index
    %51 = vector.load %arg8[%50, %c0_28] : memref<8x4xf32, #tpu.memory_space<vmem>>, vector<1x4xf32>
    tpu.vector_store %arg8[%50, %c0_28], %49 {strides = array<i32>} : memref<8x4xf32, #tpu.memory_space<vmem>>, vector<1x4xf32>,
    %c6_i32 = arith.constant 6 : i32
    %52 = arith.mulf %14, %49 : vector<1x4xf32>
    %53 = arith.index_cast %c6_i32 : i32 to index
    %c0_29 = arith.constant 0 : index
    %54 = vector.load %arg8[%53, %c0_29] : memref<8x4xf32, #tpu.memory_space<vmem>>, vector<1x4xf32>
    %55 = arith.addf %52, %54 : vector<1x4xf32>
    %56 = arith.index_cast %c6_i32 : i32 to index
    %c0_30 = arith.constant 0 : index
    %57 = vector.load %arg8[%56, %c0_30] : memref<8x4xf32, #tpu.memory_space<vmem>>, vector<1x4xf32>
    tpu.vector_store %arg8[%56, %c0_30], %55 {strides = array<i32>} : memref<8x4xf32, #tpu.memory_space<vmem>>, vector<1x4xf32>,
    %c7_i32 = arith.constant 7 : i32
    %58 = arith.mulf %14, %55 : vector<1x4xf32>
    %59 = arith.index_cast %c7_i32 : i32 to index
    %c0_31 = arith.constant 0 : index
    %60 = vector.load %arg8[%59, %c0_31] : memref<8x4xf32, #tpu.memory_space<vmem>>, vector<1x4xf32>
    %61 = arith.addf %58, %60 : vector<1x4xf32>
    %62 = arith.index_cast %c7_i32 : i32 to index
    %c0_32 = arith.constant 0 : index
    %63 = vector.load %arg8[%62, %c0_32] : memref<8x4xf32, #tpu.memory_space<vmem>>, vector<1x4xf32>
    tpu.vector_store %arg8[%62, %c0_32], %61 {strides = array<i32>} : memref<8x4xf32, #tpu.memory_space<vmem>>, vector<1x4xf32>,
    %c8_i32 = arith.constant 8 : i32
    %c0_33 = arith.constant 0 : index
    %c0_34 = arith.constant 0 : index
    %64 = vector.load %arg9[%c0_33, %c0_34] : memref<1x4xf32, #tpu.memory_space<vmem>>, vector<1x4xf32>
    tpu.vector_store %arg9[%c0_33, %c0_34], %61 {strides = array<i32>} : memref<1x4xf32, #tpu.memory_space<vmem>>, vector<1x4xf32>,
    %c0_35 = arith.constant 0 : index
    %c0_36 = arith.constant 0 : index
    %65 = vector.load %arg8[%c0_35, %c0_36] : memref<8x4xf32, #tpu.memory_space<vmem>>, vector<8x4xf32>
    %c0_37 = arith.constant 0 : index
    %c0_38 = arith.constant 0 : index
    %c0_39 = arith.constant 0 : index
    %c0_40 = arith.constant 0 : index
    %66 = vector.load %arg7[%c0_37, %c0_38, %c0_39, %c0_40] : memref<1x1x8x4xf32, #tpu.memory_space<vmem>>, vector<1x1x8x4xf32>
    %67 = vector.shape_cast %66 : vector<1x1x8x4xf32> to vector<8x4xf32>
    %68 = vector.shape_cast %65 : vector<8x4xf32> to vector<1x1x8x4xf32>
    tpu.vector_store %arg7[%c0_37, %c0_38, %c0_39, %c0_40], %68 {strides = array<i32>} : memref<1x1x8x4xf32, #tpu.memory_space<vmem>>, vector<1x1x8x4xf32>,
    return
  }
  func.func @transform_0(%arg0: i32, %arg1: i32) -> (i32, i32, i32, i32) {
    %c0_i32 = arith.constant 0 : i32
    %c0_i32_0 = arith.constant 0 : i32
    %c0_i32_1 = arith.constant 0 : i32
    return %arg0, %arg1, %c0_i32, %c0_i32_0 : i32, i32, i32, i32
  }
  func.func @transform_1(%arg0: i32, %arg1: i32) -> (i32, i32) {
    %c0_i32 = arith.constant 0 : i32
    %c0_i32_0 = arith.constant 0 : i32
    %c0_i32_1 = arith.constant 0 : i32
    return %c0_i32, %c0_i32_0 : i32, i32
  }
  func.func @transform_2(%arg0: i32, %arg1: i32) -> (i32, i32) {
    %c0_i32 = arith.constant 0 : i32
    %c0_i32_0 = arith.constant 0 : i32
    %c0_i32_1 = arith.constant 0 : i32
    return %c0_i32, %c0_i32_0 : i32, i32
  }
  func.func @transform_3(%arg0: i32, %arg1: i32) -> (i32, i32) {
    %c0_i32 = arith.constant 0 : i32
    %c0_i32_0 = arith.constant 0 : i32
    %c0_i32_1 = arith.constant 0 : i32
    return %c0_i32, %c0_i32_0 : i32, i32
  }
  func.func @transform_4(%arg0: i32, %arg1: i32) -> (i32, i32) {
    %c0_i32 = arith.constant 0 : i32
    %c0_i32_0 = arith.constant 0 : i32
    %c0_i32_1 = arith.constant 0 : i32
    return %c0_i32, %c0_i32_0 : i32, i32
  }
  func.func @transform_5(%arg0: i32, %arg1: i32) -> (i32, i32, i32, i32) {
    %c0_i32 = arith.constant 0 : i32
    %c0_i32_0 = arith.constant 0 : i32
    %c0_i32_1 = arith.constant 0 : i32
    return %arg0, %arg1, %c0_i32, %c0_i32_0 : i32, i32, i32, i32
  }
}

</mosaic_0001>

<bundles_post_ra>
// kernel: tpu_custom_call.1
= control target key start
LH: loop header
LB: loop body
LE: loop exit
PB: predicated region body
PF: predicated region fallthrough
CT: control target
= control target key end

     0   :  { %10 = vsyncpa [#allocation5], 0  ;;  %s1554_s0 = inlined_call_operand.hbm [shape: f32[2,8,4,256], index: 0, kind: input, shape index: {}]   ;;  %s1555_s1 = inlined_call_operand.hbm [shape: f32[4,4], index: 1, kind: input, shape index: {}]   ;;  %s1556_s2 = inlined_call_operand.vmem [shape: f32[1,4], index: 2, kind: input, shape index: {}]   ;;  %s1557_s3 = inlined_call_operand.vmem [shape: f32[1,4], index: 3, kind: input, shape index: {}]   ;;  %s1558_s4 = inlined_call_operand.vmem [shape: f32[2,4], index: 4, kind: input, shape index: {}]   ;;  %s1559_s5 = inlined_call_operand.vmem [shape: f32[2,1,8,4], index: 5, kind: output, shape index: {}]  }
   0x1   :  { %12 = vsyncpa [#allocation5 + $0x1], 0 }
   0x2   :  { %13 = vsyncpa [#allocation7], 0  ;;  %s1320_s18 = smov 0   ;;  %s1322_s19 = smov 0  }
   0x3   :  { %s1324_s20 = smov 0   ;;  %s1326_s21 = smov 0  }
   0x4   :  { %s1328_s22 = smov 0   ;;  %s1330_s23 = smov 0  }
   0x5 LB: > { %s1024_s24 = sadd.s32 4294967295, %s1282_s23   ;;  %s40_s25 = sadd.s32 1, %s1270_s20  ;;  %s1282_s23 = sphi %s1330_s23, %s19_s23   ;;  %s1278_s22 = sphi %s1328_s22, %s1580_s22   ;;  %s1274_s21 = sphi %s1326_s21, %s1579_s21   ;;  %s1270_s20 = sphi %s1324_s20, %s1578_s20   ;;  %s1266_s19 = sphi %s1322_s19, %s1577_s19   ;;  %s1262_s18 = sphi %s1320_s18, %s1576_s18  }
   0x6   : > { %p47_p0 = scmp.ne.s32.totalorder %s1270_s20, %s1266_s19  ;;  %p48_p1 = scmp.eq.s32.totalorder %s1282_s23, 0 }
   0x7   : > { %p53_p2 = scmp.ne.s32.totalorder %s1266_s19, %s1262_s18  ;;  %p1354_p3 = scmp.eq.s32.totalorder %s1024_s24, 0 }
   0x8   : > { %p49_p4 = por %p48_p1, %p47_p0  ;;  %p1026_p5 = scmp.ge.s32.totalorder %s1282_s23, 1 }
   0x9   : > { %s1565_s26 = scalar_select %p1354_p3, 1, 0 }
   0xa   : > { %p1361_p6 = por %p1354_p3, %p53_p2  ;;  %p176_p7 = scmp.lt.s32.totalorder %s1282_s23, 3 }
   0xb   : > { %s1284_s29 = smov [#allocation6]   ;;  %p1107_p10 = scmp.lt.s32.totalorder %s1282_s23, 2 }
   0xc   : > { %s1566_s27 = scalar_select %p1361_p6, 1, 0 }
   0xd   : > { %p1366_p8 = pnand %p1026_p5, %p176_p7  ;;  %s189_s30 = sshll.u32 %s1284_s29, 4  ;;  %s190_s30 = int_to_ptr.vmem [resolvable:$true] %s189_s30 }
   0xe   : > { %s209_s6 = sand.u32 1, %s1270_s20   ;;  %p1380_p12 = pnand %p1107_p10, %p49_p4 }
   0xf   : > { %s1567_s28 = scalar_select %p1366_p8, 1, 0 }
  0x10   : > { %p1098_p9 = pneg %p1366_p8  ;;  %s1170_s11 = scalar_lea.hbm %s1555_s1, 64 }
  0x11   : > { %s1569_s8 = scalar_select %p1380_p12, 1, 0 }
  0x12   : > { %p1376_p11 = pnand %p1098_p9, %p1354_p3  ;;  %p1171_p13 = scmp.ne.s32.totalorder %s1555_s1, %s1170_s11 }
  0x13   : > { %p1177_p5 = scmp.lt.u32.totalorder %s1170_s11, %s1555_s1 }
  0x14   : > { %p1172_p0 = pneg %p1376_p11 }
  0x16   : > { %p1173_p1 = pnand %p1172_p0, %p1171_p13 }
  0x18   : > { %p1174_p2 = pneg %p1173_p1 }
  0x1a   : > { %p1179_p4 = pnand %p1177_p5, %p1174_p2 }
  0x1c   : > { %1182 = shalt.err (!%p1179_p4)
}
  0x1d   : > { %s1183_s16 = scalar_lea.vmem %s190_s30, 64  ;;  %p1191_p3 = scmp.lt.s32.totalorder %s190_s30, %s190_s30 }
  0x1e   : > { %p1184_p7 = scmp.ne.s32.totalorder %s190_s30, %s1183_s16  ;;  %p1192_p6 = scmp.lt.s32.totalorder %s1183_s16, %s1183_s16 }
  0x20   : > { %p1186_p9 = pnand %p1184_p7, %p1172_p0  ;;  %p1193_p8 = por %p1192_p6, %p1191_p3 }
  0x22   : > { %p1187_p10 = pneg %p1186_p9 }
  0x24   : > { %p1194_p12 = pnand %p1193_p8, %p1187_p10 }
  0x26   : > { %1197 = shalt.err (!%p1194_p12)
}
  0x27   : > { %1101 = dma.hbm_to_vmem [thread:$0]  (!%p1376_p11), %s1555_s1, 64, %s190_s30, [#allocation7]  }
  0x28   : > { %s31_s24 = sadd.s32 1, %s1278_s22  ;;  %s1029_s29 = sshll.u32 %s209_s6, 6 }
  0x29   : > { %p33_p13 = scmp.ge.s32.totalorder %s31_s24, 2  ;;  %s1039_s9 = sshll.u32 %s1278_s22, 10 }
  0x2a   : > { %s213_s10 = scalar_lea.vmem [#allocation4], %s1029_s29  ;;  %s1409_s13 = scalar_lea.hbm %s1554_s0, %s1039_s9 }
  0x2b   : > { %s223_s11 = sshll.u32 %s213_s10, 4  ;;  %s1582_s24 = smov (%p33_p13, %s31_s24), 0  ;;  %s1411_s11 = int_to_ptr.vmem [resolvable:$true] %s223_s11 }
  0x2c   : > { %s35_s30 = ssub.s32 %s1278_s22, %s1582_s24  ;;  %s1421_s15 = scalar_lea.sflag [#allocation5], %s209_s6 }
  0x2d   : > { %p1415_p3 = scmp.eq.s32.totalorder %s35_s30, 0  ;;  %s1198_s16 = scalar_lea.hbm %s1409_s13, 1024 }
  0x2e   : > { %p1199_p6 = scmp.ne.s32.totalorder %s1409_s13, %s1198_s16  ;;  %p1571_p8 = scmp.ne.s32.totalorder %s1569_s8, 0 }
  0x2f   : > { %s1203_s29 = scalar_lea.hbm %s1554_s0, 2048  ;;  %p1204_p1 = scmp.lt.u32.totalorder %s1409_s13, %s1554_s0 }
  0x30   : > { %p1200_p11 = pneg %p1571_p8  ;;  %p1205_p2 = scmp.lt.u32.totalorder %s1203_s29, %s1198_s16 }
  0x31   : > { %p1207_p4 = scmp.lt.u32.totalorder %s1198_s16, %s1409_s13 }
  0x32   : > { %p1201_p12 = pnand %p1200_p11, %p1199_p6  ;;  %p1206_p5 = por %p1205_p2, %p1204_p1 }
  0x34   : > { %p1202_p0 = pneg %p1201_p12  ;;  %p1208_p7 = por %p1207_p4, %p1206_p5 }
  0x36   : > { %p1209_p9 = pnand %p1208_p7, %p1202_p0 }
  0x38   : > { %1212 = shalt.err (!%p1209_p9)
}
  0x39   : > { %s1213_s6 = scalar_lea.vmem %s1411_s11, 1024  ;;  %s1285_s7 = smov [#allocation4]  }
  0x3a   : > { %p1214_p10 = scmp.ne.s32.totalorder %s1411_s11, %s1213_s6  ;;  %s1218_s12 = sshll.u32 %s1285_s7, 4  ;;  %s1219_s12 = int_to_ptr.vmem [resolvable:$false] %s1218_s12 }
  0x3b   : > { %s1220_s30 = scalar_lea.vmem %s1219_s12, 2048  ;;  %p1221_p12 = scmp.lt.s32.totalorder %s1411_s11, %s1219_s12 }
  0x3c   : > { %p1216_p13 = pnand %p1214_p10, %p1200_p11  ;;  %p1222_p1 = scmp.lt.s32.totalorder %s1220_s30, %s1213_s6 }
  0x3e   : > { %p1217_p6 = pneg %p1216_p13  ;;  %p1223_p2 = por %p1222_p1, %p1221_p12 }
  0x40   : > { %p1224_p5 = pnand %p1223_p2, %p1217_p6 }
  0x42   : > { %1227 = shalt.err (!%p1224_p5)
}
  0x43   : > { %s1286_s16 = smov 128   ;;  %s1287_s17 = smov 8  }
  0x44   : > { %1105 = dma.hbm_to_vmem [thread:$0]  (!%p1571_p8), %s1409_s13, 1024, %s1411_s11, %s1421_s15, %s1286_s16, %s1286_s16, %s1287_s17  }
  0x45   : > { %s1454_s18 = scalar_select %p1415_p3, %s1270_s20, %s40_s25  }
  0x46   : > { %p1572_p11 = scmp.ne.s32.totalorder %s1567_s28, 0 }
  0x47   : > { %s237_s29 = sand.u32 (!%p1572_p11), 1, %s1266_s19   ;;  %p1573_p0 = scmp.ne.s32.totalorder (!%p1572_p11), %s1566_s27, 0 }
  0x48   : > { %235 = sbr.rel (%p1572_p11) target bundleno = 539 (0x21b), region = 40  ;;  %s1033_s9 = sshll.u32 (!%p1572_p11), %s237_s29, 6 }
  0x49   : > { %s238_s10 = scalar_lea.sflag (!%p1572_p11), [#allocation5], %s237_s29  ;;  %s241_s6 = scalar_lea.vmem (!%p1572_p11), [#allocation4], %s1033_s9 }
  0x4f   : > { %1253 = dma.done.wait (%p1573_p0), %s238_s10, 1024  }
  0x50   : > { %1255 = vsyncadd (%p1573_p0), %s238_s10, 4294966272  ;;  %p1574_p8 = scmp.ne.s32.totalorder %s1565_s26, 0 }
  0x52   : > { %1257 = dma.done.wait (%p1574_p8), [#allocation7], 64  }
  0x53   : > { %1259 = vsyncadd (%p1574_p8), [#allocation7], 4294967232  ;;  %vm322_vm0 = vcmask 1043456   ;;  %v290_v0 = vld [vmem:[%s241_s6] sm:$0xff]  ;;  %v292_v1 = vld [vmem:[%s241_s6 + $0x10] sm:$0xff]  ;;  %v1288_v42 = vmov 0.0   ;;  %v388_v44 = vlaneseq  ;;  %s286_s27 = scalar_lea.vmem %s1558_s4, %s1274_s21 }
  0x54   : > { %v291_v2 = vld [vmem:[%s241_s6 + $0x8] sm:$0xff]  ;;  %v306_v3 = vcombine.high %v290_v0, %v290_v0  ;;  %v323_v4 = vsel %vm322_vm0, %v290_v0, 0.0  ;;  %v308_v5 = vcombine.high %v292_v1, %v292_v1  ;;  %v333_v6 = vsel %vm322_vm0, %v292_v1, 0.0  ;;  %v293_v7 = vld [vmem:[%s241_s6 + $0x18] sm:$0xff]  ;;  %v294_v8 = vld [vmem:[%s241_s6 + $0x20] sm:$0xff]  ;;  %1067 = vmatprep.subr.mxu0 %v1288_v42  ;;  %1052 = vmatprep.subr.mxu1 %v1288_v42  ;;  %p275_p3 = scmp.lt.s32.totalorder %s1274_s21, 1 }
  0x55   : > { %v307_v9 = vcombine.high %v291_v2, %v291_v2  ;;  %v328_v10 = vsel %vm322_vm0, %v291_v2, 0.0  ;;  %v309_v11 = vcombine.high %v293_v7, %v293_v7  ;;  %v295_v12 = vld [vmem:[%s241_s6 + $0x28] sm:$0xff]  ;;  %v338_v15 = vsel %vm322_vm0, %v293_v7, 0.0  ;;  %v296_v21 = vld [vmem:[%s241_s6 + $0x30] sm:$0xff]  ;;  %v297_v22 = vld [vmem:[%s241_s6 + $0x38] sm:$0xff] }
  0x56   : > { %v324_v13 = vsel %vm322_vm0, %v306_v3, 0.0  ;;  %v334_v14 = vsel %vm322_vm0, %v308_v5, 0.0  ;;  %v310_v16 = vcombine.high %v294_v8, %v294_v8  ;;  %v311_v23 = vcombine.high %v295_v12, %v295_v12  ;;  %v372_v40 = vld [vmem:[#allocation6] sm:$0xf]  ;;  %s1584_s21 = smov (!%p275_p3, %s1274_s21), 1 }
  0x57   : > { %v325_v17 = vadd.f32 %v324_v13, %v323_v4  ;;  %v335_v18 = vadd.f32 %v334_v14, %v333_v6  ;;  %v329_v19 = vsel %vm322_vm0, %v307_v9, 0.0  ;;  %v339_v20 = vsel %vm322_vm0, %v309_v11, 0.0  ;;  %s1035_s14 = sshll.u32 %s1584_s21, 3 }
  0x58   : > { %v330_v24 = vadd.f32 %v329_v19, %v328_v10  ;;  %v340_v25 = vadd.f32 %v339_v20, %v338_v15  ;;  %v343_v26 = vsel %vm322_vm0, %v294_v8, 0.0  ;;  %v344_v27 = vsel %vm322_vm0, %v310_v16, 0.0  ;;  %s281_s12 = scalar_lea.vmem %s1559_s5, %s1035_s14 }
  0x59   : > { %326 = vadd.xlane.f32.xlu0 %v325_v17  ;;  %336 = vadd.xlane.f32.xlu1 %v335_v18  ;;  %v348_v28 = vsel %vm322_vm0, %v295_v12, 0.0  ;;  %v349_v29 = vsel %vm322_vm0, %v311_v23, 0.0  ;;  %v312_v30 = vcombine.high %v296_v21, %v296_v21  ;;  %v313_v31 = vcombine.high %v297_v22, %v297_v22 }
  0x5a   : > { %v345_v32 = vadd.f32 %v344_v27, %v343_v26  ;;  %v350_v33 = vadd.f32 %v349_v29, %v348_v28  ;;  %v353_v34 = vsel %vm322_vm0, %v296_v21, 0.0  ;;  %v358_v36 = vsel %vm322_vm0, %v297_v22, 0.0  ;;  %v1036_v28 = vld [vmem:[%s1557_s3] ss:$0 sm:$0xff] }
  0x5b   : > { %v354_v35 = vsel %vm322_vm0, %v312_v30, 0.0  ;;  %v359_v37 = vsel %vm322_vm0, %v313_v31, 0.0  ;;  %v440_v41 = vsel %vm322_vm0, %v372_v40, 0  ;;  %vm1289_vm1 = vmmov 0  }
  0x5c   : > { %v355_v38 = vadd.f32 %v354_v35, %v353_v34  ;;  %v360_v39 = vadd.f32 %v359_v37, %v358_v36  ;;  %v1485_v43 = vand.u32 4294901760, %v440_v41  ;;  %1069 = vmatprep.mubr.msk.f32.mxu0 %vm1289_vm1, %v1288_v42  ;;  %1054 = vmatprep.mubr.msk.f32.mxu1 %vm1289_vm1, %v1288_v42  ;;  %v389_v45 = vand.u32 127, %v388_v44 }
  0x5d   : > { %331 = vadd.xlane.f32.xlu0 %v330_v24  ;;  %341 = vadd.xlane.f32.xlu1 %v340_v25  ;;  %v391_v46 = vshrl.u32 %v388_v44, 7  ;;  %vm422_vm2 = vcmask 1041409   ;;  %vm424_vm3 = vcmask 1042434   ;;  %vm426_vm4 = vcmask 1043459   ;;  %v287_v25 = vld [vmem:[%s286_s27] sm:$0x1] }
  0x5e   : > { %1068 = vmatpush3.msra.mxu0 %v1485_v43  ;;  %1053 = vmatpush3.msra.mxu1 %v1485_v43  ;;  %vm428_vm5 = vcmask 1044484   ;;  %vm430_vm6 = vcmask 1045509   ;;  %vm432_vm7 = vcmask 1046534   ;;  %vm434_vm8 = vcmask 1047559  }
  0x5f   : > { %1057 = vmatprep.subr.mxu1 %v1288_v42  ;;  %1072 = vmatprep.subr.mxu0 %v1288_v42  ;;  %v392_v49 = vsub.s32 %v389_v45, %v391_v46  ;;  %v520_v12 = vsub.f32 %v440_v41, %v1485_v43  ;;  %vm436_vm9 = vcmask 31744   ;;  %vm288_vm10 = vcmask 24576  }
  0x60   : > { %289 = vst.msk [vmem:[#allocation3] sm:$0x1] %vm288_vm10, %v287_v25 }
  0x61   : > { %346 = vadd.xlane.f32.xlu0 %v345_v32  ;;  %351 = vadd.xlane.f32.xlu1 %v350_v33  ;;  %v521_v17 = vand.u32 4294901760, %v520_v12  ;;  %v889_v33 = vld [vmem:[%s1556_s2] sm:$0x1] }
  0x63   : > { %v522_v20 = vsub.f32 %v520_v12, %v521_v17 }
  0x65   : > { %356 = vadd.xlane.f32.xlu0 %v355_v38  ;;  %361 = vadd.xlane.f32.xlu1 %v360_v39  ;;  %v523_v23 = vand.u32 4294901760, %v522_v20 }
  0x67   : > { %v890_v34 = vld [vmem:[#allocation3] sm:$0x1] }
  0x68   : > { %v891_v35 = vmul.f32 %v890_v34, %v889_v33 }
  0xe6   : > { %v327_v47 = vpop.xlane.xlu0 %326  ;;  %v337_v48 = vpop.xlane.xlu1 %336 }
  0xe7   : > { %v364_v50 = vmul.f32 0.00390625, %v327_v47  ;;  %v366_v51 = vmul.f32 0.00390625, %v337_v48 }
  0xe9   : > { %v393_v56 = vrot.slane %v364_v50, %v392_v49  ;;  %v401_v59 = vrot.slane %v366_v51, %v392_v49 }
  0xea   : > { %v332_v52 = vpop.xlane.xlu0 %331  ;;  %v342_v53 = vpop.xlane.xlu1 %341 }
  0xeb   : > { %v365_v54 = vmul.f32 0.00390625, %v332_v52  ;;  %v367_v55 = vmul.f32 0.00390625, %v342_v53 }
  0xed   : > { %v397_v57 = vrot.slane %v365_v54, %v392_v49  ;;  %v405_v58 = vrot.slane %v367_v55, %v392_v49 }
  0xee   : > { %v347_v60 = vpop.xlane.xlu0 %346  ;;  %v352_v61 = vpop.xlane.xlu1 %351 }
  0xef   : > { %v423_v62 = vsel %vm422_vm2, %v397_v57, %v393_v56  ;;  %v368_v63 = vmul.f32 0.00390625, %v347_v60  ;;  %v369_v0 = vmul.f32 0.00390625, %v352_v61 }
  0xf0   : > { %v425_v1 = vsel %vm424_vm3, %v401_v59, %v423_v62 }
  0xf1   : > { %v427_v2 = vsel %vm426_vm4, %v405_v58, %v425_v1  ;;  %v409_v3 = vrot.slane %v368_v63, %v392_v49  ;;  %v413_v4 = vrot.slane %v369_v0, %v392_v49 }
  0xf2   : > { %v357_v5 = vpop.xlane.xlu0 %356  ;;  %v362_v6 = vpop.xlane.xlu1 %361 }
  0xf3   : > { %v429_v7 = vsel %vm428_vm5, %v409_v3, %v427_v2  ;;  %v370_v8 = vmul.f32 0.00390625, %v357_v5  ;;  %v371_v9 = vmul.f32 0.00390625, %v362_v6 }
  0xf4   : > { %v431_v13 = vsel %vm430_vm6, %v413_v4, %v429_v7 }
  0xf5   : > { %v417_v10 = vrot.slane %v370_v8, %v392_v49  ;;  %v421_v11 = vrot.slane %v371_v9, %v392_v49 }
  0xf7   : > { %v433_v14 = vsel %vm432_vm7, %v417_v10, %v431_v13 }
  0xf8   : > { %v435_v15 = vsel %vm434_vm8, %v421_v11, %v433_v14 }
  0xf9   : > { %v437_v16 = vsel %vm436_vm9, %v435_v15, 0 }
  0xfa   : > { %v508_v18 = vand.u32 4294901760, %v437_v16 }
  0xfc   : > { %v509_v19 = vsub.f32 %v437_v16, %v508_v18 }
  0xfe   : > { %v510_v21 = vand.u32 4294901760, %v509_v19 }
 0x100   : > { %1070 = vmatmul.mubr.f32.vlgmr.msra.gmra.mrb[0].mxu0 %v510_v21  ;;  %v511_v22 = vsub.f32 %v509_v19, %v510_v21 }
 0x101   : > { %1073 = vmatpush3.msra.mxu0 %v521_v17  ;;  %1074 = vmatprep.mubr.msk.f32.mxu0 %vm1289_vm1, %v1288_v42 }
 0x102   : > { %v512_v24 = vand.u32 4294901760, %v511_v22  ;;  %1077 = vmatprep.subr.mxu0 %v1288_v42 }
 0x104   : > { %1055 = vmatmul.mubr.f32.vlgmr.msra.gmra.mrb[0].mxu1 %v512_v24 }
 0x105   : > { %1058 = vmatpush3.msra.mxu1 %v523_v23  ;;  %1059 = vmatprep.mubr.msk.f32.mxu1 %vm1289_vm1, %v1288_v42 }
 0x106   : > { %1062 = vmatprep.subr.mxu1 %v1288_v42 }
 0x108   : > { %1075 = vmatmul.mubr.f32.vlgmr.msra.gmra.mrb[0].mxu0 %v508_v18 }
 0x109   : > { %1078 = vmatpush3.msra.mxu0 %v1485_v43  ;;  %1079 = vmatprep.mubr.msk.f32.mxu0 %vm1289_vm1, %v1288_v42 }
 0x10c   : > { %1060 = vmatmul.mubr.f32.vlgmr.msra.gmra.mrb[0].mxu1 %v508_v18 }
 0x10d   : > { %1063 = vmatpush3.msra.mxu1 %v520_v12  ;;  %1064 = vmatprep.mubr.msk.f32.mxu1 %vm1289_vm1, %v1288_v42 }
 0x110   : > { %1080 = vmatmul.mubr.f32.vlgmr.msra.gmra.mrb[0].mxu0 %v508_v18 }
 0x114   : > { %1065 = vmatmul.mubr.f32.vlgmr.msra.gmra.mrb[0].mxu1 %v509_v19 }
 0x1e3   : > { %v884_v26 = vpop.f32.mrb[0].mxu0 }
 0x1e4   : > { %v1081_v27 = vpop.f32.mrb[1].mxu0 }
 0x1e7   : > { %v664_v29 = vpop.f32.mrb[0].mxu1 }
 0x1e8   : > { %v1082_v30 = vadd.f32 %v1036_v28, %v664_v29  ;;  %v1066_v31 = vpop.f32.mrb[1].mxu1 }
 0x1ea   : > { %v1083_v32 = vadd.f32 %v1082_v30, %v884_v26 }
 0x1ec   : > { %888 = vst.msk [vmem:[#allocation2] sm:$0xff] %vm436_vm9, %v1083_v32 }
 0x1f3   : > { %v892_v36 = vld [vmem:[#allocation2] sm:$0x1]  ;;  %v897_v39 = vld [vmem:[#allocation2 + $0x1] sm:$0x1]  ;;  %v901_v42 = vld [vmem:[#allocation2 + $0x2] sm:$0x1] }
 0x1f4   : > { %v893_v37 = vadd.f32 %v892_v36, %v891_v35  ;;  %v905_v45 = vld [vmem:[#allocation2 + $0x3] sm:$0x1]  ;;  %v909_v48 = vld [vmem:[#allocation2 + $0x4] sm:$0x1]  ;;  %v913_v51 = vld [vmem:[#allocation2 + $0x5] sm:$0x1] }
 0x1f5   : > { %v917_v54 = vld [vmem:[#allocation2 + $0x6] sm:$0x1]  ;;  %v921_v57 = vld [vmem:[#allocation2 + $0x7] sm:$0x1] }
 0x1f6   : > { %895 = vst.msk [vmem:[#allocation2] sm:$0x1] %vm288_vm10, %v893_v37  ;;  %v896_v38 = vmul.f32 %v893_v37, %v889_v33 }
 0x1f8   : > { %v898_v40 = vadd.f32 %v897_v39, %v896_v38 }
 0x1fa   : > { %899 = vst.msk [vmem:[#allocation2 + $0x1] sm:$0x1] %vm288_vm10, %v898_v40  ;;  %v900_v41 = vmul.f32 %v898_v40, %v889_v33 }
 0x1fc   : > { %v902_v43 = vadd.f32 %v901_v42, %v900_v41 }
 0x1fe   : > { %903 = vst.msk [vmem:[#allocation2 + $0x2] sm:$0x1] %vm288_vm10, %v902_v43  ;;  %v904_v44 = vmul.f32 %v902_v43, %v889_v33 }
 0x200   : > { %v906_v46 = vadd.f32 %v905_v45, %v904_v44 }
 0x202   : > { %907 = vst.msk [vmem:[#allocation2 + $0x3] sm:$0x1] %vm288_vm10, %v906_v46  ;;  %v908_v47 = vmul.f32 %v906_v46, %v889_v33 }
 0x204   : > { %v910_v49 = vadd.f32 %v909_v48, %v908_v47 }
 0x206   : > { %911 = vst.msk [vmem:[#allocation2 + $0x4] sm:$0x1] %vm288_vm10, %v910_v49  ;;  %v912_v50 = vmul.f32 %v910_v49, %v889_v33 }
 0x208   : > { %v914_v52 = vadd.f32 %v913_v51, %v912_v50 }
 0x20a   : > { %915 = vst.msk [vmem:[#allocation2 + $0x5] sm:$0x1] %vm288_vm10, %v914_v52  ;;  %v916_v53 = vmul.f32 %v914_v52, %v889_v33 }
 0x20c   : > { %v918_v55 = vadd.f32 %v917_v54, %v916_v53 }
 0x20e   : > { %919 = vst.msk [vmem:[#allocation2 + $0x6] sm:$0x1] %vm288_vm10, %v918_v55  ;;  %v920_v56 = vmul.f32 %v918_v55, %v889_v33 }
 0x210   : > { %v922_v58 = vadd.f32 %v921_v57, %v920_v56 }
 0x212   : > { %923 = vst.msk [vmem:[#allocation2 + $0x7] sm:$0x1] %vm288_vm10, %v922_v58  ;;  %924 = vst.msk [vmem:[#allocation3] sm:$0x1] %vm288_vm10, %v922_v58 }
 0x219   : > { %v925_v59 = vld [vmem:[#allocation2] sm:$0xff] }
 0x21a   : > { %926 = vst.msk [vmem:[%s281_s12] sm:$0xff] %vm436_vm9, %v925_v59 }
 0x21b PF: > { %s19_s23 = sadd.s32 1, %s1282_s23   ;;  %s1575_s30 = smov %s1454_s18 }
 0x21c   : > { %p16_p4 = scmp.ge.s32.totalorder %s19_s23, 4   ;;  %s1576_s18 = smov %s1266_s19 }
 0x21d   : > { %s1577_s19 = smov %s1270_s20  ;;  %s1578_s20 = smov %s1575_s30 }
 0x21e   : > { %s1579_s21 = smov %s1278_s22  ;;  %s1580_s22 = smov %s1582_s24 }
 0x21f   :  { %18 = sbr.rel (!%p16_p4) target bundleno = 5 (0x5), region = 89 }
 0x226   :  { %952 = vsyncpa [#allocation5], 1 }
 0x227   :  { %954 = vsyncpa [#allocation5 + $0x1], 1 }
 0x228   :  { %955 = vsyncpa [#allocation7], 1 }

</bundles_post_ra>
